<compile_context>
chip_gen: v7x
topology: tpu7x:2x2x1
jax: 0.10.0
libtpu: 0.0.40
codegen_flags: <defaults>
</compile_context>

<pallas_src>
import math

import jax
import jax.numpy as jnp
from jax.experimental import pallas as pl
from jax.experimental.pallas import tpu as pltpu

EPS = 1e-5  # nn.InstanceNorm2d default eps


def _num_tensorcores():
    """1 TC/chip on v5e/v6e, 2 on v7x.  Conservative fallback = 1."""
    try:
        kind = jax.devices()[0].device_kind.lower()
    except Exception:
        kind = ""
    return 2 if ("v7" in kind or "7x" in kind) else 1


def _make_decoder_kernel(H, W, Cout, K, block_n):
    WCo = W * Cout
    M = block_n * H
    inv_n = 1.0 / float(H * W)

    def kernel(s_ref, b_ref, pool_ref, bcast_ref, o_ref):
        """s_ref:    (block_n, H+2, K)  H-padded, lane-dense bf16 input slab
        b_ref:     (3, K, W*Cout)      banded conv weights (kw taps + W pad fused)
        pool_ref:  (W*Cout, Cout)      per-channel pooling matrix (f32, resident)
        bcast_ref: (Cout, W*Cout)      per-channel broadcast matrix (f32, resident)
        o_ref:     (block_n, H, W*Cout) lane-dense output slab
        """
        # --- Conv2d(k=3, s=1, p=1): 3 batched MXU matmuls, M = block_n*H ---
        acc = jnp.dot(s_ref[:, 0:H, :].reshape(M, K), b_ref[0],
                      preferred_element_type=jnp.float32)
        for kh in (1, 2):
            acc = acc + jnp.dot(s_ref[:, kh:kh + H, :].reshape(M, K), b_ref[kh],
                                preferred_element_type=jnp.float32)
        acc = acc.reshape(block_n, H, WCo)

        # --- InstanceNorm2d(affine=False) + ReLU, one-pass statistics ---
        colsum = jnp.sum(acc, axis=1)                 # (block_n, W*Cout)
        colsq = jnp.sum(acc * acc, axis=1)            # (block_n, W*Cout)
        stats = jnp.concatenate([colsum, colsq], axis=0)          # (2B, W*Cout)
        pooled = jnp.dot(stats, pool_ref[...],
                         preferred_element_type=jnp.float32) * inv_n  # (2B, Cout)
        mean_c = pooled[:block_n]                                     # (B, Cout)
        var_c = jnp.maximum(pooled[block_n:] - mean_c * mean_c, 0.0)
        scale_c = jax.lax.rsqrt(var_c + EPS)                          # (B, Cout)
        ms = jnp.concatenate([mean_c, scale_c], axis=0)               # (2B, Cout)
        ms_lane = jnp.dot(ms, bcast_ref[...],
                          preferred_element_type=jnp.float32)         # (2B, W*Cout)
        mean_l = ms_lane[:block_n][:, None, :]                        # (B,1,W*Cout)
        scale_l = ms_lane[block_n:][:, None, :]
        y = jnp.maximum((acc - mean_l) * scale_l, 0.0)
        o_ref[...] = y.astype(o_ref.dtype)

    return kernel


def decoder_forward_nhwc(x_nhwc, weight_hwio, bias=None, *, block_n=None,
                         compute_dtype=jnp.bfloat16, out_dtype=jnp.float32):
    """NHWC core path (no layout passes).

    x_nhwc:      (N, H, W, Cin) float32
    weight_hwio: (3, 3, Cin, Cout) float32
    bias:        (Cout,) — accepted for API parity; a per-channel bias is a
                 mathematical no-op under InstanceNorm2d(affine=False), so it
                 is dropped.
    returns      (N, H, W, Cout) in `out_dtype`.
    """
    del bias
    N, H, W, Cin = x_nhwc.shape
    Cout = weight_hwio.shape[-1]
    WCo = W * Cout
    Hp = H + 2

    # K-dim alignment: pad Cin so K = W*Cin_p is a multiple of 128 when cheap.
    g = math.gcd(W, 128)
    cmul = 128 // g
    Cin_p = ((Cin + cmul - 1) // cmul) * cmul
    if Cin_p > max(2 * Cin, Cin + 8):   # don't blow the slab up for alignment
        Cin_p = Cin
    K = W * Cin_p

    # One grid step per TensorCore (1 on v5e/v6e, 2 on v7x), images batched
    # into the matmul M dimension inside each step.
    if block_n is None:
        steps = _num_tensorcores()
        steps = steps if (N % steps == 0 and N >= steps) else 1
        block_n = N // steps
    assert N % block_n == 0
    grid_steps = N // block_n

    # H zero padding (conv padding=1 along H) + channel alignment pad: one pass.
    xp = jnp.pad(x_nhwc, ((0, 0), (1, 1), (0, 0), (0, Cin_p - Cin)))
    slab = xp.reshape(N, Hp, K).astype(compute_dtype)

    # Banded ("Toeplitz") conv weights; fold the kw taps AND the W zero padding:
    #   banded[kh, w_in*Cin_p + c, w_out*Cout + co] = weight[kh, w_in-w_out+1, c, co]
    # for 0 <= w_in-w_out+1 < 3 (else 0).  One-time weight preprocessing.
    wpad = jnp.pad(weight_hwio, ((0, 0), (0, 0), (0, Cin_p - Cin), (0, 0)))
    kw_idx = jnp.arange(W)[:, None] - jnp.arange(W)[None, :] + 1        # (Win, Wout)
    onehot = jnp.stack([(kw_idx == kw) for kw in range(3)], axis=0)
    onehot = onehot.astype(weight_hwio.dtype)                           # (3, Win, Wout)
    banded = jnp.einsum("kiw,hkco->hicwo", onehot, wpad)
    banded = banded.reshape(3, K, WCo).astype(compute_dtype)
    banded_bytes = 3 * K * WCo * jnp.dtype(compute_dtype).itemsize
    # TODO(synk): add an output-column (W) tile to the grid once the banded
    #             weight outgrows VMEM at production widths (~3*W x raw weight).
    assert banded_bytes <= 24 * 1024 * 1024, "banded weight too large; add W tiling"

    # Per-channel pooling / broadcast matrices, hoisted out of the kernel and
    # DMA'd once (constant index_map -> resident).
    lane_ch = jnp.arange(WCo) % Cout
    pool = (lane_ch[:, None] == jnp.arange(Cout)[None, :]).astype(jnp.float32)
    bcast = jnp.transpose(pool)                                         # (Cout, WCo)

    kernel = _make_decoder_kernel(H, W, Cout, K, block_n)

    out = pl.pallas_call(
        kernel,
        out_shape=jax.ShapeDtypeStruct((N, H, WCo), out_dtype),
        grid_spec=pltpu.PrefetchScalarGridSpec(
            num_scalar_prefetch=0,
            grid=(grid_steps,),
            in_specs=[
                pl.BlockSpec((block_n, Hp, K), lambda n: (n, 0, 0)),
                pl.BlockSpec((3, K, WCo), lambda n: (0, 0, 0)),
                pl.BlockSpec((WCo, Cout), lambda n: (0, 0)),
                pl.BlockSpec((Cout, WCo), lambda n: (0, 0)),
            ],
            out_specs=pl.BlockSpec((block_n, H, WCo), lambda n: (n, 0, 0)),
        ),
        compiler_params=pltpu.CompilerParams(
            dimension_semantics=("parallel",),
            vmem_limit_bytes=32 * 1024 * 1024,
        ),
    )(slab, banded, pool, bcast)

    return out.reshape(N, H, W, Cout)


def decoder_forward(feat_nchw, weight_hwio, bias=None, **kwargs):
    """NCHW wrapper for parity with the PyTorch module interface."""
    x = jnp.transpose(feat_nchw, (0, 2, 3, 1))
    y = decoder_forward_nhwc(x, weight_hwio, bias, **kwargs)
    return jnp.transpose(y, (0, 3, 1, 2))


def _reference(feat_nchw, weight_hwio, bias):
    """Pure-JAX f32 reference: Conv2d(p=1) -> InstanceNorm2d -> ReLU."""
    x = jnp.transpose(feat_nchw, (0, 2, 3, 1)).astype(jnp.float32)
    y = jax.lax.conv_general_dilated(
        x, weight_hwio.astype(jnp.float32),
        window_strides=(1, 1), padding=((1, 1), (1, 1)),
        dimension_numbers=("NHWC", "HWIO", "NHWC"))
    y = y + bias[None, None, None, :]
    mu = jnp.mean(y, axis=(1, 2), keepdims=True)
    var = jnp.mean((y - mu) ** 2, axis=(1, 2), keepdims=True)
    y = jnp.maximum((y - mu) * jax.lax.rsqrt(var + EPS), 0.0)
    return jnp.transpose(y, (0, 3, 1, 2))


if __name__ == "__main__":
    key = jax.random.PRNGKey(0)
    k_x, k_w, k_b = jax.random.split(key, 3)

    N, Cin, Cout, H, W = 2, 4, 8, 16, 16

    feat = jax.random.normal(k_x, (N, Cin, H, W), dtype=jnp.float32)
    # Deterministic synthetic parameters (PyTorch Conv2d-like fan-in scaling).
    fan_in = Cin * 3 * 3
    bound = 1.0 / (fan_in ** 0.5)
    weight = jax.random.uniform(
        k_w, (3, 3, Cin, Cout), minval=-bound, maxval=bound, dtype=jnp.float32
    )
    bias = jax.random.uniform(
        k_b, (Cout,), minval=-bound, maxval=bound, dtype=jnp.float32
    )

    out = decoder_forward(feat, weight, bias)
    jax.block_until_ready(out)
    assert out.shape == (N, Cout, H, W)

    ref = _reference(feat, weight, bias)
    max_err = float(jnp.max(jnp.abs(out - ref)))
    assert max_err < 1e-1, f"max abs err vs reference = {max_err}"
    print("KERNEL_OK")
</pallas_src>

<mosaic_0001>
module attributes {stable_mosaic.version = 11 : i64} {
  func.func @kernel(%arg0: i32, %arg1: memref<2x18x128xbf16, #tpu.memory_space<vmem>>, %arg2: memref<3x128x128xbf16, #tpu.memory_space<vmem>>, %arg3: memref<128x8xf32, #tpu.memory_space<vmem>>, %arg4: memref<8x128xf32, #tpu.memory_space<vmem>>, %arg5: memref<2x16x128xf32, #tpu.memory_space<vmem>>) attributes {dimension_semantics = [#tpu.dimension_semantics<parallel>], iteration_bounds = array<i64: 1>, scalar_prefetch = 0 : i64, scratch_operands = 0 : i64, tpu.core_type = #tpu.core_type<tc>, window_params = [{transform_indices = @transform_0, window_bounds = array<i64: 2, 18, 128>}, {pipeline_mode = #tpu.pipeline_mode<synchronous>, transform_indices = @transform_1, window_bounds = array<i64: 3, 128, 128>}, {pipeline_mode = #tpu.pipeline_mode<synchronous>, transform_indices = @transform_2, window_bounds = array<i64: 128, 8>}, {pipeline_mode = #tpu.pipeline_mode<synchronous>, transform_indices = @transform_3, window_bounds = array<i64: 8, 128>}, {transform_indices = @transform_4, window_bounds = array<i64: 2, 16, 128>}]} {
    %c0 = arith.constant 0 : index
    %c0_0 = arith.constant 0 : index
    %c0_1 = arith.constant 0 : index
    %0 = vector.load %arg1[%c0, %c0_0, %c0_1] : memref<2x18x128xbf16, #tpu.memory_space<vmem>>, vector<2x16x128xbf16>
    %1 = vector.shape_cast %0 : vector<2x16x128xbf16> to vector<32x128xbf16>
    %c0_2 = arith.constant 0 : index
    %c0_3 = arith.constant 0 : index
    %c0_4 = arith.constant 0 : index
    %2 = vector.load %arg2[%c0_2, %c0_3, %c0_4] : memref<3x128x128xbf16, #tpu.memory_space<vmem>>, vector<1x128x128xbf16>
    %3 = vector.shape_cast %2 : vector<1x128x128xbf16> to vector<128x128xbf16>
    %cst = arith.constant dense<0.000000e+00> : vector<32x128xf32>
    %4 = tpu.matmul %1, %3, %cst {dimension_numbers = #tpu.dot_dimension_numbers<[1], [0], [0], [1], [0, 0, 1, 1], [], []>} : vector<32x128xbf16>, vector<128x128xbf16>, vector<32x128xf32> -> vector<32x128xf32>
    %c0_5 = arith.constant 0 : index
    %c1 = arith.constant 1 : index
    %c0_6 = arith.constant 0 : index
    %5 = vector.load %arg1[%c0_5, %c1, %c0_6] : memref<2x18x128xbf16, #tpu.memory_space<vmem>>, vector<2x16x128xbf16>
    %6 = vector.shape_cast %5 : vector<2x16x128xbf16> to vector<32x128xbf16>
    %c1_7 = arith.constant 1 : index
    %c0_8 = arith.constant 0 : index
    %c0_9 = arith.constant 0 : index
    %7 = vector.load %arg2[%c1_7, %c0_8, %c0_9] : memref<3x128x128xbf16, #tpu.memory_space<vmem>>, vector<1x128x128xbf16>
    %8 = vector.shape_cast %7 : vector<1x128x128xbf16> to vector<128x128xbf16>
    %cst_10 = arith.constant dense<0.000000e+00> : vector<32x128xf32>
    %9 = tpu.matmul %6, %8, %cst_10 {dimension_numbers = #tpu.dot_dimension_numbers<[1], [0], [0], [1], [0, 0, 1, 1], [], []>} : vector<32x128xbf16>, vector<128x128xbf16>, vector<32x128xf32> -> vector<32x128xf32>
    %10 = arith.addf %4, %9 : vector<32x128xf32>
    %c0_11 = arith.constant 0 : index
    %c2 = arith.constant 2 : index
    %c0_12 = arith.constant 0 : index
    %11 = vector.load %arg1[%c0_11, %c2, %c0_12] : memref<2x18x128xbf16, #tpu.memory_space<vmem>>, vector<2x16x128xbf16>
    %12 = vector.shape_cast %11 : vector<2x16x128xbf16> to vector<32x128xbf16>
    %c2_13 = arith.constant 2 : index
    %c0_14 = arith.constant 0 : index
    %c0_15 = arith.constant 0 : index
    %13 = vector.load %arg2[%c2_13, %c0_14, %c0_15] : memref<3x128x128xbf16, #tpu.memory_space<vmem>>, vector<1x128x128xbf16>
    %14 = vector.shape_cast %13 : vector<1x128x128xbf16> to vector<128x128xbf16>
    %cst_16 = arith.constant dense<0.000000e+00> : vector<32x128xf32>
    %15 = tpu.matmul %12, %14, %cst_16 {dimension_numbers = #tpu.dot_dimension_numbers<[1], [0], [0], [1], [0, 0, 1, 1], [], []>} : vector<32x128xbf16>, vector<128x128xbf16>, vector<32x128xf32> -> vector<32x128xf32>
    %16 = arith.addf %10, %15 : vector<32x128xf32>
    %17 = vector.shape_cast %16 : vector<32x128xf32> to vector<2x16x128xf32>
    %cst_17 = arith.constant dense<0.000000e+00> : vector<2x128xf32>
    %18 = vector.multi_reduction <add>, %17, %cst_17 [1] : vector<2x16x128xf32> to vector<2x128xf32>
    %19 = arith.mulf %17, %17 : vector<2x16x128xf32>
    %cst_18 = arith.constant dense<0.000000e+00> : vector<2x128xf32>
    %20 = vector.multi_reduction <add>, %19, %cst_18 [1] : vector<2x16x128xf32> to vector<2x128xf32>
    %21 = tpu.concatenate %18, %20 in 0 : vector<2x128xf32>, vector<2x128xf32> -> vector<4x128xf32>
    %c0_19 = arith.constant 0 : index
    %c0_20 = arith.constant 0 : index
    %22 = vector.load %arg3[%c0_19, %c0_20] : memref<128x8xf32, #tpu.memory_space<vmem>>, vector<128x8xf32>
    %cst_21 = arith.constant dense<0.000000e+00> : vector<4x8xf32>
    %23 = tpu.matmul %21, %22, %cst_21 {dimension_numbers = #tpu.dot_dimension_numbers<[1], [0], [0], [1], [0, 0, 1, 1], [], []>} : vector<4x128xf32>, vector<128x8xf32>, vector<4x8xf32> -> vector<4x8xf32>
    %cst_22 = arith.constant 3.906250e-03 : f32
    %24 = vector.broadcast %cst_22 : f32 to vector<4x8xf32>
    %25 = arith.mulf %23, %24 : vector<4x8xf32>
    %26 = vector.extract_strided_slice %25 {offsets = [0, 0], sizes = [2, 8], strides = [1, 1]} : vector<4x8xf32> to vector<2x8xf32>
    %27 = vector.extract_strided_slice %25 {offsets = [2, 0], sizes = [2, 8], strides = [1, 1]} : vector<4x8xf32> to vector<2x8xf32>
    %28 = arith.mulf %26, %26 : vector<2x8xf32>
    %29 = arith.subf %27, %28 : vector<2x8xf32>
    %cst_23 = arith.constant 0.000000e+00 : f32
    %30 = vector.broadcast %cst_23 : f32 to vector<2x8xf32>
    %31 = arith.maximumf %29, %30 : vector<2x8xf32>
    %cst_24 = arith.constant 9.99999974E-6 : f32
    %32 = vector.broadcast %cst_24 : f32 to vector<2x8xf32>
    %33 = arith.addf %31, %32 : vector<2x8xf32>
    %34 = math.rsqrt %33 : vector<2x8xf32>
    %35 = tpu.concatenate %26, %34 in 0 : vector<2x8xf32>, vector<2x8xf32> -> vector<4x8xf32>
    %c0_25 = arith.constant 0 : index
    %c0_26 = arith.constant 0 : index
    %36 = vector.load %arg4[%c0_25, %c0_26] : memref<8x128xf32, #tpu.memory_space<vmem>>, vector<8x128xf32>
    %cst_27 = arith.constant dense<0.000000e+00> : vector<4x128xf32>
    %37 = tpu.matmul %35, %36, %cst_27 {dimension_numbers = #tpu.dot_dimension_numbers<[1], [0], [0], [1], [0, 0, 1, 1], [], []>} : vector<4x8xf32>, vector<8x128xf32>, vector<4x128xf32> -> vector<4x128xf32>
    %38 = vector.extract_strided_slice %37 {offsets = [0, 0], sizes = [2, 128], strides = [1, 1]} : vector<4x128xf32> to vector<2x128xf32>
    %39 = vector.shape_cast %38 : vector<2x128xf32> to vector<2x1x128xf32>
    %40 = vector.extract_strided_slice %37 {offsets = [2, 0], sizes = [2, 128], strides = [1, 1]} : vector<4x128xf32> to vector<2x128xf32>
    %41 = vector.shape_cast %40 : vector<2x128xf32> to vector<2x1x128xf32>
    %42 = vector.broadcast %39 : vector<2x1x128xf32> to vector<2x16x128xf32>
    %43 = arith.subf %17, %42 : vector<2x16x128xf32>
    %44 = vector.broadcast %41 : vector<2x1x128xf32> to vector<2x16x128xf32>
    %45 = arith.mulf %43, %44 : vector<2x16x128xf32>
    %cst_28 = arith.constant 0.000000e+00 : f32
    %46 = vector.broadcast %cst_28 : f32 to vector<2x16x128xf32>
    %47 = arith.maximumf %45, %46 : vector<2x16x128xf32>
    %c0_29 = arith.constant 0 : index
    %c0_30 = arith.constant 0 : index
    %c0_31 = arith.constant 0 : index
    %48 = vector.load %arg5[%c0_29, %c0_30, %c0_31] : memref<2x16x128xf32, #tpu.memory_space<vmem>>, vector<2x16x128xf32>
    tpu.vector_store %arg5[%c0_29, %c0_30, %c0_31], %47 {strides = array<i32>} : memref<2x16x128xf32, #tpu.memory_space<vmem>>, vector<2x16x128xf32>,
    return
  }
  func.func @transform_0(%arg0: i32) -> (i32, i32, i32) {
    %c0_i32 = arith.constant 0 : i32
    %c0_i32_0 = arith.constant 0 : i32
    %c0_i32_1 = arith.constant 0 : i32
    return %arg0, %c0_i32, %c0_i32_0 : i32, i32, i32
  }
  func.func @transform_1(%arg0: i32) -> (i32, i32, i32) {
    %c0_i32 = arith.constant 0 : i32
    %c0_i32_0 = arith.constant 0 : i32
    %c0_i32_1 = arith.constant 0 : i32
    %c0_i32_2 = arith.constant 0 : i32
    return %c0_i32, %c0_i32_0, %c0_i32_1 : i32, i32, i32
  }
  func.func @transform_2(%arg0: i32) -> (i32, i32) {
    %c0_i32 = arith.constant 0 : i32
    %c0_i32_0 = arith.constant 0 : i32
    %c0_i32_1 = arith.constant 0 : i32
    return %c0_i32, %c0_i32_0 : i32, i32
  }
  func.func @transform_3(%arg0: i32) -> (i32, i32) {
    %c0_i32 = arith.constant 0 : i32
    %c0_i32_0 = arith.constant 0 : i32
    %c0_i32_1 = arith.constant 0 : i32
    return %c0_i32, %c0_i32_0 : i32, i32
  }
  func.func @transform_4(%arg0: i32) -> (i32, i32, i32) {
    %c0_i32 = arith.constant 0 : i32
    %c0_i32_0 = arith.constant 0 : i32
    %c0_i32_1 = arith.constant 0 : i32
    return %arg0, %c0_i32, %c0_i32_0 : i32, i32, i32
  }
}

</mosaic_0001>

<bundles_post_ra>
// kernel: tpu_custom_call.1
= control target key start
LH: loop header
LB: loop body
LE: loop exit
PB: predicated region body
PF: predicated region fallthrough
CT: control target
= control target key end

     0   :  { %9 = vsyncpa [#allocation3], 0  ;;  %s1298_s0 = inlined_call_operand.vmem [shape: bf16[2,18,128], index: 0, kind: input, shape index: {}]   ;;  %s1299_s1 = inlined_call_operand.hbm [shape: bf16[3,128,128], index: 1, kind: input, shape index: {}]   ;;  %s1300_s2 = inlined_call_operand.vmem [shape: f32[128,8], index: 2, kind: input, shape index: {}]   ;;  %s1301_s3 = inlined_call_operand.vmem [shape: f32[8,128], index: 3, kind: input, shape index: {}]   ;;  %s1302_s4 = inlined_call_operand.hbm [shape: f32[2,16,128], index: 4, kind: output, shape index: {}]  }
   0x1   :  { %10 = vsyncpa [#allocation4], 0  ;;  %s1079_s15 = smov [#allocation2]   ;;  %s1031_s19 = scalar_lea.hbm %s1299_s1, 3072 }
   0x2   :  { %s18_s16 = sshll.u32 %s1079_s15, 4  ;;  %p1032_p0 = scmp.ne.s32.totalorder %s1299_s1, %s1031_s19  ;;  %s19_s16 = int_to_ptr.vmem [resolvable:$true] %s18_s16 }
   0x3   :  { %p1035_p1 = scmp.lt.u32.totalorder %s1031_s19, %s1299_s1 }
   0x5   :  { %p1037_p2 = pnand %p1035_p1, %p1032_p0 }
   0x7   :  { %1040 = shalt.err (!%p1037_p2)
}
   0x8   :  { %s1041_s24 = scalar_lea.vmem %s19_s16, 3072  ;;  %p1046_p4 = scmp.lt.s32.totalorder %s19_s16, %s19_s16 }
   0x9   :  { %p1042_p3 = scmp.ne.s32.totalorder %s19_s16, %s1041_s24  ;;  %p1047_p5 = scmp.lt.s32.totalorder %s1041_s24, %s1041_s24 }
   0xb   :  { %p1048_p6 = por %p1047_p5, %p1046_p4 }
   0xd   :  { %p1049_p7 = pnand %p1048_p6, %p1042_p3 }
   0xf   :  { %1052 = shalt.err (!%p1049_p7)
}
  0x10   :  { %s1080_s25 = smov 64   ;;  %s1081_s26 = smov 4  }
  0x11   :  { %24 = dma.hbm_to_vmem [thread:$0]  %s1299_s1, 3072, %s19_s16, [#allocation3], %s1080_s25, %s1080_s25, %s1081_s26  }
  0x12   :  { %1075 = dma.done.wait [#allocation3], 3072  }
  0x13   :  { %1076 = vsyncadd [#allocation3], 4294964224  ;;  %v1003_v0 = vld [vmem:[#allocation2] sm:$0xff]   ;;  %v1004_v1 = vld [vmem:[#allocation2 + $0x8] sm:$0xff]   ;;  %vm55_vm0 = vsmask.f32 3328 }
  0x14   :  { %881 = vmatprep.subr.bf16.mxu0 %v1003_v0  ;;  %v1005_v2 = vld [vmem:[#allocation2 + $0x10] sm:$0xff]   ;;  %v1006_v3 = vld [vmem:[#allocation2 + $0x18] sm:$0xff]   ;;  %v1011_v4 = vld [vmem:[#allocation2 + $0x40] sm:$0xff]   ;;  %vm56_vm1 = vsmask.f32 7440  ;;  %vm343_vm2 = vcmask 1042432  }
  0x15   :  { %882 = vmatpush3.bf16.msra.mxu0 %v1003_v0  ;;  %v33_v5 = vld [vmem:[%s1298_s0] sm:$0xf]  ;;  %v1132_v6 = vld [vmem:[%s1298_s0 + $0x4] sm:$0xf]  ;;  %861 = vmatprep.subr.bf16.mxu1 %v1011_v4  ;;  %v1007_v11 = vld [vmem:[#allocation2 + $0x20] sm:$0xff]   ;;  %vm344_vm3 = vcmask 1046532  }
  0x16   :  { %883 = vmatprep.subr.bf16.mxu0 %v1004_v1  ;;  %v59_v7 = vshrl.u32 %v33_v5, 16  ;;  %v62_v8 = vshll.u32 %v33_v5, 16  ;;  %v789_v9 = vcombine.low %v33_v5, %v1132_v6  ;;  %862 = vmatpush3.bf16.msra.mxu1 %v1011_v4  ;;  %v1014_v10 = vld [vmem:[#allocation2 + $0x48] sm:$0xff]   ;;  %v72_v13 = vshrl.u32 %v1132_v6, 16  ;;  %v1017_v15 = vld [vmem:[#allocation2 + $0x50] sm:$0xff]   ;;  %v1019_v20 = vld [vmem:[#allocation2 + $0x58] sm:$0xff]  }
  0x17   :  { %863 = vmatprep.subr.bf16.mxu1 %v1014_v10  ;;  %v1139_v16 = vld [vmem:[%s1298_s0 + $0xc] sm:$0xf]  ;;  %v1008_v17 = vld [vmem:[#allocation2 + $0x28] sm:$0xff]   ;;  %v1144_v18 = vld [vmem:[%s1298_s0 + $0x10] sm:$0xf]  ;;  %v68_v21 = vshll.u32 %v1132_v6, 16 }
  0x18   :  { %897 = vmatprep.mubr.bf16.mxu0 %v789_v9  ;;  %v61_v12 = vrot.slane %v59_v7, 4  ;;  %v64_v14 = vrot.slane %v62_v8, 5  ;;  %v83_v19 = vshrl.u32 %v1139_v16, 16  ;;  %v1009_v22 = vld [vmem:[#allocation2 + $0x30] sm:$0xff]   ;;  %v86_v23 = vshll.u32 %v1139_v16, 16  ;;  %v1021_v28 = vld [vmem:[#allocation2 + $0x60] sm:$0xff]   ;;  %vm1157_vm4 = vmor %vm55_vm0, %vm56_vm1 }
  0x19   :  { %884 = vmatpush3.bf16.msra.mxu0 %v1004_v1  ;;  %v74_v24 = vrot.slane %v72_v13, 4  ;;  %v96_v25 = vshrl.u32 %v1144_v18, 16  ;;  %v70_v27 = vrot.slane %v68_v21, 5  ;;  %v348_v29 = vrot.slane %v1132_v6, 5  ;;  %v1010_v32 = vld [vmem:[#allocation2 + $0x38] sm:$0xff]   ;;  %v1023_v37 = vld [vmem:[#allocation2 + $0x68] sm:$0xff]   ;;  %vm1171_vm5 = vmor %vm343_vm2, %vm344_vm3 }
  0x1a   :  { %885 = vmatprep.subr.bf16.mxu0 %v1005_v2  ;;  %864 = vmatpush3.bf16.msra.mxu1 %v1014_v10  ;;  %v65_v26 = vor.u32 %v64_v14, %v61_v12  ;;  %v92_v31 = vshll.u32 %v1144_v18, 16  ;;  %v85_v33 = vrot.slane %v83_v19, 4  ;;  %v88_v34 = vrot.slane %v86_v23, 5  ;;  %v53_v39 = vld [vmem:[%s1298_s0 + $0x8] sm:$0x1]  ;;  %v1013_v50 = vld [vmem:[#allocation2 + $0x80] sm:$0xff]  }
  0x1b   :  { %865 = vmatprep.subr.bf16.mxu1 %v1017_v15  ;;  %v75_v30 = vor.u32 %v74_v24, %v70_v27  ;;  %v98_v36 = vrot.slane %v96_v25, 4  ;;  %v350_v42 = vrot.slane %v348_v29, 4  ;;  %v78_v43 = vshll.u32 %v53_v39, 16  ;;  %v1164_v46 = vld [vmem:[%s1298_s0 + $0x14] sm:$0x1]  ;;  %v1025_v51 = vld [vmem:[#allocation2 + $0x70] sm:$0xff]  }
  0x1c   :  { %v66_v35 = vrot.slane %v65_v26, 4  ;;  %v94_v38 = vrot.slane %v92_v31, 5  ;;  %v351_v44 = vrot.slane %v53_v39, 5  ;;  %v89_v45 = vor.u32 %v88_v34, %v85_v33  ;;  %v337_v48 = vld [vmem:[%s1298_s0] sm:$0xe]  ;;  %v1027_v1 = vld [vmem:[#allocation2 + $0x78] sm:$0xff]  }
  0x1d   :  { %886 = vmatpush3.bf16.msra.mxu0 %v1005_v2  ;;  %v76_v41 = vrot.slane %v75_v30, 4  ;;  %v80_v53 = vrot.slane %v78_v43, 5  ;;  %v102_v54 = vshll.u32 %v1164_v46, 16  ;;  %v799_v55 = vrot.slane %v337_v48, 9  ;;  %v1016_v0 = vld [vmem:[#allocation2 + $0x88] sm:$0xff]   ;;  %v1018_v5 = vld [vmem:[#allocation2 + $0x90] sm:$0xff]  }
  0x1e   :  { %887 = vmatprep.subr.bf16.mxu0 %v1006_v3  ;;  %866 = vmatpush3.bf16.msra.mxu1 %v1017_v15  ;;  %v99_v47 = vor.u32 %v98_v36, %v94_v38  ;;  %v71_v52 = vsel %vm1157_vm4, %v66_v35, %v70_v27  ;;  %v790_v56 = vcombine.low %v1139_v16, %v1144_v18  ;;  %v90_v58 = vrot.slane %v89_v45, 4  ;;  %v530_v6 = vld [vmem:[%s1300_s2] sm:$0xff]  ;;  %v531_v7 = vld [vmem:[%s1300_s2 + $0x8] sm:$0xff]  ;;  %v1020_v10 = vld [vmem:[#allocation2 + $0x98] sm:$0xff]  }
  0x1f   :  { %867 = vmatprep.subr.bf16.mxu1 %v1019_v20  ;;  %v81_v57 = vsel %vm1157_vm4, %v76_v41, %v80_v53  ;;  %v352_v59 = vsel %vm1171_vm5, %v350_v42, %v351_v44  ;;  %v104_v62 = vrot.slane %v102_v54, 5  ;;  %v349_v63 = vsel %vm1171_vm5, %v799_v55, %v348_v29  ;;  %v1022_v12 = vld [vmem:[#allocation2 + $0xa0] sm:$0xff]   ;;  %v1024_v13 = vld [vmem:[#allocation2 + $0xa8] sm:$0xff]   ;;  %v1026_v15 = vld [vmem:[#allocation2 + $0xb0] sm:$0xff]  }
  0x20   :  { %v779_v60 = vcombine.low %v71_v52, %v81_v57  ;;  %v100_v61 = vrot.slane %v99_v47, 4  ;;  %v801_v2 = vcombine.low %v349_v63, %v352_v59  ;;  %v962_v9 = vpack.c.bf16 %v531_v7, %v530_v6  ;;  %v338_v16 = vld [vmem:[%s1298_s0 + $0xc] sm:$0xe]  ;;  %v1028_v21 = vld [vmem:[#allocation2 + $0xb8] sm:$0xff]   ;;  %v533_v25 = vld [vmem:[%s1300_s2 + $0x18] sm:$0xff] }
  0x21   :  { %888 = vmatpush3.bf16.msra.mxu0 %v1006_v3  ;;  %v95_v3 = vsel %vm1157_vm4, %v90_v58, %v94_v38  ;;  %v355_v14 = vrot.slane %v1144_v18, 5  ;;  %v800_v19 = vrot.slane %v338_v16, 9  ;;  %v532_v24 = vld [vmem:[%s1300_s2 + $0x10] sm:$0xff]  ;;  %v534_v27 = vld [vmem:[%s1300_s2 + $0x20] sm:$0xff]  ;;  %v537_v31 = vld [vmem:[%s1300_s2 + $0x38] sm:$0xff]  ;;  %vm1083_vm6 = vmmov 0  }
  0x22   :  { %889 = vmatprep.subr.bf16.mxu0 %v1007_v11  ;;  %868 = vmatpush3.bf16.msra.mxu1 %v1019_v20  ;;  %v105_v4 = vsel %vm1157_vm4, %v100_v61, %v104_v62  ;;  %v965_v26 = vpack.c.bf16 %v533_v25, %v532_v24  ;;  %v536_v30 = vld [vmem:[%s1300_s2 + $0x30] sm:$0xff]  ;;  %v538_v33 = vld [vmem:[%s1300_s2 + $0x40] sm:$0xff]  ;;  %v539_v34 = vld [vmem:[%s1300_s2 + $0x48] sm:$0xff]  ;;  %v1084_v45 = vmov 0.0   ;;  %vm520_vm7 = vcmask 1041409  }
  0x23   :  { %869 = vmatprep.subr.bf16.mxu1 %v1021_v28  ;;  %877 = vmatprep.mubr.bf16.mxu1 %v779_v60  ;;  %v780_v8 = vcombine.low %v95_v3, %v105_v4  ;;  %v357_v20 = vrot.slane %v355_v14, 4  ;;  %v974_v35 = vpack.c.bf16 %v539_v34, %v538_v33  ;;  %v540_v36 = vld [vmem:[%s1300_s2 + $0x50] sm:$0xff]  ;;  %v542_v39 = vld [vmem:[%s1300_s2 + $0x60] sm:$0xff]  ;;  %v543_v40 = vld [vmem:[%s1300_s2 + $0x68] sm:$0xff]  ;;  %vm525_vm8 = vcmask 1043459  }
  0x24   :  { %v980_v41 = vpack.c.bf16 %v543_v40, %v542_v39  ;;  %v544_v42 = vld [vmem:[%s1300_s2 + $0x70] sm:$0xff]  ;;  %v545_v43 = vld [vmem:[%s1300_s2 + $0x78] sm:$0xff]  ;;  %vm528_vm9 = vcmask 1041408   ;;  %vm627_vm10 = vcmask 64512   ;;  %v1085_v40 = vmov 1966171168  }
  0x25   :  { %890 = vmatpush3.bf16.msra.mxu0 %v1007_v11  ;;  %v1082_v11 = vmov 0.0|0.0   ;;  %v983_v44 = vpack.c.bf16 %v545_v43, %v544_v42  ;;  %v705_v42 = vlaneseq }
  0x26   :  { %891 = vmatprep.subr.bf16.mxu0 %v1008_v17  ;;  %870 = vmatpush3.bf16.msra.mxu1 %v1021_v28  ;;  %v535_v28 = vld [vmem:[%s1300_s2 + $0x28] sm:$0xff] }
  0x27   :  { %871 = vmatprep.subr.bf16.mxu1 %v1023_v37  ;;  %v968_v29 = vpack.c.bf16 %v535_v28, %v534_v27 }
  0x29   :  { %892 = vmatpush3.bf16.msra.mxu0 %v1008_v17  ;;  %v358_v17 = vrot.slane %v1164_v46, 5 }
  0x2a   :  { %893 = vmatprep.subr.bf16.mxu0 %v1009_v22  ;;  %872 = vmatpush3.bf16.msra.mxu1 %v1023_v37  ;;  %v541_v37 = vld [vmem:[%s1300_s2 + $0x58] sm:$0xff] }
  0x2b   :  { %873 = vmatprep.subr.bf16.mxu1 %v1025_v51  ;;  %v359_v18 = vsel %vm1171_vm5, %v357_v20, %v358_v17  ;;  %v977_v38 = vpack.c.bf16 %v541_v37, %v540_v36 }
  0x2d   :  { %894 = vmatpush3.bf16.msra.mxu0 %v1009_v22  ;;  %v356_v22 = vsel %vm1171_vm5, %v800_v19, %v355_v14 }
  0x2e   :  { %895 = vmatprep.subr.bf16.mxu0 %v1010_v32  ;;  %874 = vmatpush3.bf16.msra.mxu1 %v1025_v51  ;;  %v802_v23 = vcombine.low %v356_v22, %v359_v18 }
  0x2f   :  { %875 = vmatprep.subr.bf16.mxu1 %v1027_v1 }
  0x31   :  { %896 = vmatpush3.bf16.msra.mxu0 %v1010_v32  ;;  %v971_v32 = vpack.c.bf16 %v537_v31, %v536_v30 }
  0x32   :  { %901 = vmatprep.subr.bf16.mxu0 %v1013_v50  ;;  %876 = vmatpush3.bf16.msra.mxu1 %v1027_v1 }
  0x33   :  { %961 = vmatprep.subr.bf16.mxu1 %v1082_v11 }
  0x34   :  { %898 = vmatmul.mubr.bf16.vlgmr.msra.gmra.mrb[0].mxu0 %v790_v56 }
  0x35   :  { %902 = vmatpush3.bf16.msra.mxu0 %v1013_v50  ;;  %917 = vmatprep.mubr.bf16.mxu0 %v801_v2 }
  0x36   :  { %903 = vmatprep.subr.bf16.mxu0 %v1016_v0  ;;  %878 = vmatmul.mubr.bf16.vlgmr.msra.gmra.mrb[0].mxu1 %v780_v8 }
  0x37   :  { %963 = vmatpush3.bf16.msra.mxu1 %v962_v9  ;;  %953 = vmatprep.mubr.msk.f32.mxu1 %vm1083_vm6, %v1084_v45 }
  0x38   :  { %964 = vmatprep.subr.bf16.mxu1 %v1082_v11 }
  0x39   :  { %904 = vmatpush3.bf16.msra.mxu0 %v1016_v0 }
  0x3a   :  { %905 = vmatprep.subr.bf16.mxu0 %v1018_v5 }
  0x3b   :  { %966 = vmatpush3.bf16.msra.mxu1 %v965_v26 }
  0x3c   :  { %967 = vmatprep.subr.bf16.mxu1 %v1082_v11 }
  0x3d   :  { %906 = vmatpush3.bf16.msra.mxu0 %v1018_v5 }
  0x3e   :  { %907 = vmatprep.subr.bf16.mxu0 %v1020_v10 }
  0x3f   :  { %969 = vmatpush3.bf16.msra.mxu1 %v968_v29  ;;  %v626_v29 = vld [vmem:[%s1301_s3] sm:$0xff]  ;;  %s1086_s3 = smov [#allocation5]  }
  0x40   :  { %970 = vmatprep.subr.bf16.mxu1 %v1082_v11  ;;  %s767_s0 = sshll.u32 %s1086_s3, 4  ;;  %s768_s0 = int_to_ptr.vmem [resolvable:$true] %s767_s0 }
  0x41   :  { %908 = vmatpush3.bf16.msra.mxu0 %v1020_v10  ;;  %s1053_s23 = scalar_lea.vmem %s768_s0, 512  ;;  %p1058_p9 = scmp.lt.s32.totalorder %s768_s0, %s768_s0 }
  0x42   :  { %909 = vmatprep.subr.bf16.mxu0 %v1022_v12  ;;  %p1054_p8 = scmp.ne.s32.totalorder %s768_s0, %s1053_s23  ;;  %p1059_p10 = scmp.lt.s32.totalorder %s1053_s23, %s1053_s23 }
  0x43   :  { %972 = vmatpush3.bf16.msra.mxu1 %v971_v32 }
  0x44   :  { %973 = vmatprep.subr.bf16.mxu1 %v1082_v11  ;;  %p1060_p11 = por %p1059_p10, %p1058_p9 }
  0x45   :  { %910 = vmatpush3.bf16.msra.mxu0 %v1022_v12 }
  0x46   :  { %911 = vmatprep.subr.bf16.mxu0 %v1024_v13  ;;  %p1061_p12 = pnand %p1060_p11, %p1054_p8 }
  0x47   :  { %975 = vmatpush3.bf16.msra.mxu1 %v974_v35 }
  0x48   :  { %976 = vmatprep.subr.bf16.mxu1 %v1082_v11 }
  0x49   :  { %912 = vmatpush3.bf16.msra.mxu0 %v1024_v13 }
  0x4a   :  { %913 = vmatprep.subr.bf16.mxu0 %v1026_v15 }
  0x4b   :  { %978 = vmatpush3.bf16.msra.mxu1 %v977_v38 }
  0x4c   :  { %979 = vmatprep.subr.bf16.mxu1 %v1082_v11 }
  0x4d   :  { %914 = vmatpush3.bf16.msra.mxu0 %v1026_v15 }
  0x4e   :  { %915 = vmatprep.subr.bf16.mxu0 %v1028_v21 }
  0x4f   :  { %981 = vmatpush3.bf16.msra.mxu1 %v980_v41  ;;  %v703_v41 = vunpack.c.l.s4 %v1085_v40 }
  0x50   :  { %982 = vmatprep.subr.bf16.mxu1 %v1082_v11 }
  0x51   :  { %916 = vmatpush3.bf16.msra.mxu0 %v1028_v21  ;;  %v704_v43 = vunpack.c.0.s8 %v703_v41 }
  0x53   :  { %984 = vmatpush3.bf16.msra.mxu1 %v983_v44  ;;  %v706_v44 = vshrl.u32 %v705_v42, 7 }
  0x54   :  { %918 = vmatmul.mubr.bf16.vlgmr.msra.gmra.mrb[0].mxu0 %v802_v23  ;;  %956 = vmatprep.subr.mxu1 %v1084_v45 }
 0x109   :  { %v879_v46 = vpop.f32.mrb[0].mxu1 }
 0x10a   :  { %v213_v47 = vpop.f32.mrb[1].mxu1 }
 0x10b   :  { %v880_v48 = vpop.f32.mrb[2].mxu1 }
 0x10c   :  { %v216_v49 = vpop.f32.mrb[3].mxu1 }
 0x127   :  { %v919_v50 = vpop.f32.mrb[0].mxu0 }
 0x128   :  { %v1256_v51 = vadd.f32 %v919_v50, %v879_v46  ;;  %v467_v52 = vpop.f32.mrb[1].mxu0 }
 0x129   :  { %v1258_v53 = vadd.f32 %v467_v52, %v213_v47  ;;  %v920_v54 = vpop.f32.mrb[2].mxu0 }
 0x12a   :  { %v1260_v55 = vadd.f32 %v920_v54, %v880_v48  ;;  %v470_v56 = vpop.f32.mrb[3].mxu0  ;;  %v502_v58 = vmul.f32 %v1256_v51, %v1256_v51  ;;  %v728_v48 = vsub.s32 0, %v706_v44 }
 0x12b   :  { %v1262_v57 = vadd.f32 %v470_v56, %v216_v49  ;;  %v500_v61 = vmul.f32 %v1258_v53, %v1258_v53 }
 0x12c   :  { %v493_v59 = vadd.f32 %v1260_v55, %v1256_v51  ;;  %v503_v60 = vmul.f32 %v1260_v55, %v1260_v55 }
 0x12d   :  { %v486_v62 = vadd.f32 %v1262_v57, %v1258_v53  ;;  %v501_v63 = vmul.f32 %v1262_v57, %v1262_v57 }
 0x12e   :  { %v494_v0 = vrot.slane %v493_v59, 4  ;;  %v511_v1 = vadd.f32 %v503_v60, %v502_v58 }
 0x12f   :  { %v487_v2 = vrot.slane %v486_v62, 4  ;;  %v504_v3 = vadd.f32 %v501_v63, %v500_v61 }
 0x130   :  { %v495_v4 = vadd.f32 %v494_v0, %v493_v59  ;;  %v512_v5 = vrot.slane %v511_v1, 4 }
 0x131   :  { %v488_v6 = vadd.f32 %v487_v2, %v486_v62  ;;  %v505_v7 = vrot.slane %v504_v3, 4 }
 0x132   :  { %v496_v8 = vrot.slane %v495_v4, 2  ;;  %v513_v9 = vadd.f32 %v512_v5, %v511_v1 }
 0x133   :  { %v489_v10 = vrot.slane %v488_v6, 2  ;;  %v506_v11 = vadd.f32 %v505_v7, %v504_v3 }
 0x134   :  { %v497_v12 = vadd.f32 %v496_v8, %v495_v4  ;;  %v514_v13 = vrot.slane %v513_v9, 2 }
 0x135   :  { %v490_v14 = vadd.f32 %v489_v10, %v488_v6  ;;  %v507_v15 = vrot.slane %v506_v11, 2 }
 0x136   :  { %v498_v16 = vrot.slane %v497_v12, 1  ;;  %v515_v17 = vadd.f32 %v514_v13, %v513_v9 }
 0x137   :  { %v491_v19 = vrot.slane %v490_v14, 1  ;;  %v508_v20 = vadd.f32 %v507_v15, %v506_v11 }
 0x138   :  { %v516_v21 = vrot.slane %v515_v17, 1  ;;  %v499_v18 = vadd.f32 %v498_v16, %v497_v12 }
 0x139   :  { %v492_v22 = vadd.f32 %v491_v19, %v490_v14  ;;  %v509_v23 = vrot.slane %v508_v20, 1 }
 0x13a   :  { %v517_v24 = vadd.f32 %v516_v21, %v515_v17 }
 0x13b   :  { %v510_v25 = vadd.f32 %v509_v23, %v508_v20  ;;  %v521_v26 = vsel %vm520_vm7, %v499_v18, %v492_v22 }
 0x13d   :  { %v526_v27 = vsel %vm525_vm8, %v517_v24, %v510_v25 }
 0x13e   :  { %v529_v28 = vsel %vm528_vm9, %v521_v26, %v526_v27 }
 0x13f   :  { %954 = vmatmul.mubr.f32.vlgmr.msra.gmra.mrb[4].mxu1 %v529_v28 }
 0x140   :  { %958 = vmatprep.mubr.msk.f32.mxu1 %vm1083_vm6, %v1084_v45  ;;  %957 = vmatpush3.msra.mxu1 %v626_v29  ;;  %v707_v45 = vsub.s32 %v704_v43, %v706_v44 }
 0x212   :  { %v612_v30 = vpop.f32.mrb[4].mxu1 }
 0x213   :  { %v616_v31 = vmul.f32 0.00390625, %v612_v30  ;;  %v955_v32 = vpop.f32.mrb[5].mxu1 }
 0x215   :  { %v617_v33 = vmul.f32 %v616_v31, %v616_v31 }
 0x217   :  { %v619_v34 = vrot.slane %v617_v33, 6 }
 0x219   :  { %v621_v35 = vsub.f32 %v616_v31, %v619_v34 }
 0x21b   :  { %v622_v36 = vmax.f32 %v621_v35, 0.0 }
 0x21d   :  { %v623_v37 = vadd.f32 1e-05, %v622_v36 }
 0x21f   :  { %1029 = vrsqrt.f32 %v623_v37 }
 0x229   :  { %v1030_v38 = vpop.eup %1029 }
 0x22a   :  { %v625_v39 = vsel %vm528_vm9, %v616_v31, %v1030_v38 }
 0x22b   :  { %959 = vmatmul.mubr.msk.f32.vlgmr.msra.gmra.mrb[6].mxu1 %vm627_vm10, %v625_v39 }
 0x2fe   :  { %v697_v46 = vpop.f32.mrb[6].mxu1 }
 0x2ff   :  { %v708_v47 = vrot.slane %v697_v46, %v707_v45  ;;  %v960_v49 = vpop.f32.mrb[7].mxu1 }
 0x301   :  { %v709_v50 = vcombine.high %v708_v47, %v708_v47  ;;  %v716_v52 = vrot.slane %v708_v47, %v707_v45 }
 0x303   :  { %v723_v54 = vrot.slane %v709_v50, %v707_v45  ;;  %v724_v56 = vcombine.high %v716_v52, %v716_v52  ;;  %v729_v58 = vrot.slane %v716_v52, %v728_v48 }
 0x305   :  { %v725_v59 = vcombine.high %v723_v54, %v723_v54  ;;  %v733_v60 = vrot.slane %v723_v54, %v728_v48  ;;  %v736_v61 = vsub.f32 %v1258_v53, %v729_v58  ;;  %v737_v62 = vsub.f32 %v1262_v57, %v729_v58 }
 0x306   :  { %v743_v63 = vrot.slane %v724_v56, %v728_v48 }
 0x307   :  { %v738_v0 = vsub.f32 %v1256_v51, %v733_v60  ;;  %v739_v1 = vsub.f32 %v1260_v55, %v733_v60  ;;  %v747_v2 = vrot.slane %v725_v59, %v728_v48 }
 0x308   :  { %v750_v3 = vmul.f32 %v743_v63, %v736_v61  ;;  %v751_v4 = vmul.f32 %v743_v63, %v737_v62 }
 0x309   :  { %v752_v5 = vmul.f32 %v747_v2, %v738_v0  ;;  %v753_v6 = vmul.f32 %v747_v2, %v739_v1 }
 0x30a   :  { %v754_v7 = vmax.f32 %v750_v3, 0.0  ;;  %v755_v8 = vmax.f32 %v751_v4, 0.0 }
 0x30b   :  { %v756_v9 = vmax.f32 %v752_v5, 0.0  ;;  %v757_v10 = vmax.f32 %v753_v6, 0.0 }
 0x30c   :  { %758 = vst [vmem:[#allocation5] sm:$0xff] %v754_v7  ;;  %759 = vst [vmem:[#allocation5 + $0x8] sm:$0xff] %v755_v8 }
 0x30d   :  { %760 = vst [vmem:[#allocation5 + $0x10] sm:$0xff] %v756_v9  ;;  %761 = vst [vmem:[#allocation5 + $0x18] sm:$0xff] %v757_v10 }
 0x30e   :  { %1064 = shalt.err (!%p1061_p12)
}
 0x30f   :  { %s1065_s26 = scalar_lea.hbm %s1302_s4, 512 }
 0x310   :  { %p1066_p13 = scmp.ne.s32.totalorder %s1302_s4, %s1065_s26  ;;  %p1069_p0 = scmp.lt.u32.totalorder %s1065_s26, %s1302_s4 }
 0x312   :  { %p1071_p1 = pnand %p1069_p0, %p1066_p13 }
 0x314   :  { %1074 = shalt.err (!%p1071_p1)
}
 0x315   :  { %s1087_s5 = smov 128   ;;  %s1088_s6 = smov 8  }
 0x316   :  { %773 = dma.vmem_to_hbm [thread:$0]  %s768_s0, 512, %s1302_s4, [#allocation4], %s1087_s5, %s1087_s5, %s1088_s6  }
 0x317   :  { %1077 = dma.done.wait [#allocation4], 512  }
 0x318   :  { %1078 = vsyncadd [#allocation4], 4294966784 }
 0x319   :  { %777 = vsyncpa [#allocation3], 1 }
 0x31a   :  { %778 = vsyncpa [#allocation4], 1 }

</bundles_post_ra>
